<compile_context>
chip_gen: v7x
topology: tpu7x:2x2x1
jax: 0.10.0
libtpu: 0.0.40
codegen_flags: <defaults>
</compile_context>

<pallas_src>
import functools

import jax
import jax.numpy as jnp
from jax.experimental import pallas as pl
from jax.experimental.pallas import tpu as pltpu

_LANE = 128
_SUBLANE = 8


def _round_up(v, m):
    return ((v + m - 1) // m) * m


def _sublane_pack(dtype):
    # 8 rows for 4-byte dtypes, 16 for bf16/f16, 32 for int8/fp8.
    return max(_SUBLANE, 32 // jnp.dtype(dtype).itemsize)


def _pick_tm(m, sub):
    """M tile: big enough to amortize per-step overhead; even #tiles for v7x."""
    if m <= 2 * sub:                        # tiny problem: a single tile
        return _round_up(max(m, sub), sub)
    if m <= 2 * 512:                        # small/medium: exactly 2 tiles (2 TCs)
        return _round_up(pl.cdiv(m, 2), sub)
    tm = 512                                # large: 512-row tiles (~85% HBM roofline)
    if pl.cdiv(m, tm) % 2:                  # keep the tile count even for megacore
        tm = _round_up(pl.cdiv(m, pl.cdiv(m, tm) + 1), sub)
    return tm


def _pick_tk(k, e_pad, itemsize, budget=4 << 20):
    """Whole-K unless the resident weight slab would strain VMEM (v7x: 64 MiB)."""
    if k * e_pad * itemsize <= budget or k % _LANE:
        return k
    tk = k
    for cand in range(_LANE, k, _LANE):     # largest lane-aligned divisor in budget
        if k % cand == 0 and cand * e_pad * itemsize <= budget:
            tk = cand
    return tk


def _patch_embed_kernel(x_ref, w_ref, b_ref, o_ref, acc_ref):
    # x_ref: (tm, tk) patch rows     w_ref: (tk, E_pad)    b_ref: (1, E_pad) f32
    # o_ref: (tm, E_pad)             acc_ref: (tm, E_pad)  f32 scratch
    k = pl.program_id(1)

    @pl.when(k == 0)
    def _init():
        acc_ref[...] = jnp.zeros_like(acc_ref)

    acc_ref[...] += jnp.dot(x_ref[...], w_ref[...],
                            preferred_element_type=jnp.float32)

    @pl.when(k == pl.num_programs(1) - 1)
    def _finalize():
        o_ref[...] = (acc_ref[...] + b_ref[...]).astype(o_ref.dtype)


def patch_embedding(x, weight, bias, patch_size, *,
                    compute_dtype=jnp.bfloat16, tk=None):
    """x: (B, C, H, W); weight: (E, C, P, P); bias: (E,)  ->  (B, N, E)."""
    B, C, H, W = x.shape
    E = weight.shape[0]
    P = patch_size
    if H % P != 0 or W % P != 0:
        raise ValueError(f"H={H}, W={W} must be divisible by patch_size={P}")
    Hp, Wp = H // P, W // P
    N = Hp * Wp
    K = C * P * P
    M = B * N
    out_dtype = x.dtype

    cdt = jnp.dtype(compute_dtype) if compute_dtype is not None else x.dtype
    x = x.astype(cdt)
    weight = weight.astype(cdt)

    # Patch extraction glue (same jit).  allow_input_fusion below lets XLA fuse
    # this producer chain into the pallas_call input instead of bouncing a
    # materialised `patches` array through HBM.
    patches = x.reshape(B, C, Hp, P, Wp, P).transpose(0, 2, 4, 1, 3, 5)
    patches = patches.reshape(M, K)

    # Conv weight -> (K, E) matmul weight with matching (c, kh, kw) ordering.
    # Tiny one-off op; also fusion-allowed so XLA can fold it in.
    w_mat = weight.reshape(E, K).T
    b_mat = bias.reshape(1, E).astype(jnp.float32)          # bias add in f32

    # Lane-dense output: pad E to a multiple of 128 (avoids masked vst.msk).
    E_pad = _round_up(E, _LANE)
    if E_pad != E:
        w_mat = jnp.pad(w_mat, ((0, 0), (0, E_pad - E)))
        b_mat = jnp.pad(b_mat, ((0, 0), (0, E_pad - E)))

    itemsize = jnp.dtype(cdt).itemsize
    out_isz = jnp.dtype(out_dtype).itemsize
    sub = _sublane_pack(cdt)

    # --- tiling --------------------------------------------------------------
    tm = _pick_tm(M, sub)
    M_pad = _round_up(M, tm)
    if M_pad != M:
        patches = jnp.pad(patches, ((0, M_pad - M), (0, 0)))

    if tk is None:
        tk = _pick_tk(K, E_pad, itemsize)
    if tk != K and (K % tk != 0 or tk % _LANE != 0):
        raise ValueError(f"tk={tk} must divide K={K} and be a multiple of {_LANE}")

    num_mt, num_kt = M_pad // tm, K // tk
    grid = (num_mt, num_kt)

    # Constant-index blocks are single-buffered (double-buffering them is pure
    # VMEM waste).  When K is tiled the weight streams, so keep default buffering.
    if num_kt == 1:
        w_spec = pl.BlockSpec((tk, E_pad), lambda i, k: (0, 0),
                              pipeline_mode=pl.Buffered(1))
    else:
        w_spec = pl.BlockSpec((tk, E_pad), lambda i, k: (k, 0))
    b_spec = pl.BlockSpec((1, E_pad), lambda i, k: (0, 0),
                          pipeline_mode=pl.Buffered(1))

    # --- VMEM budget (v7x: 64 MiB physical; v5e scoped default: 16 MiB) ------
    vmem_est = (2 * tm * tk * itemsize                           # patches (2-buf)
                + (1 if num_kt == 1 else 2) * tk * E_pad * itemsize
                + E_pad * 4                                      # bias
                + 2 * tm * E_pad * out_isz                       # output (2-buf)
                + tm * E_pad * 4)                                # f32 accumulator
    vmem_limit = None
    if vmem_est > (16 << 20):                # above the v5e scoped default
        vmem_limit = min(vmem_est * 3 // 2, 64 << 20)            # v7x-safe cap

    cost = pl.CostEstimate(
        flops=2 * M * K * E,
        transcendentals=0,
        bytes_accessed=(B * C * H * W + K * E) * itemsize + M * E * out_isz,
    )

    out = pl.pallas_call(
        _patch_embed_kernel,
        out_shape=jax.ShapeDtypeStruct((M_pad, E_pad), out_dtype),
        grid_spec=pltpu.PrefetchScalarGridSpec(
            num_scalar_prefetch=0,
            grid=grid,
            in_specs=[
                pl.BlockSpec((tm, tk), lambda i, k: (i, k)),     # patch rows
                w_spec,                                          # weight (K-tile)
                b_spec,                                          # bias row
            ],
            out_specs=pl.BlockSpec((tm, E_pad), lambda i, k: (i, 0)),
            scratch_shapes=[pltpu.VMEM((tm, E_pad), jnp.float32)],
        ),
        compiler_params=pltpu.CompilerParams(
            dimension_semantics=("parallel", "arbitrary"),
            allow_input_fusion=[True, True, True],   # fuse producers into inputs
            vmem_limit_bytes=vmem_limit,
        ),
        cost_estimate=cost,
    )(patches, w_mat, b_mat)

    # Drop M tail / E lane padding, restore (B, N, E).
    return out[:M, :E].reshape(B, N, E)


if __name__ == "__main__":
    # Small shapes consistent with the module: B=2, C=4, H=W=16, P=8, E=32.
    B, C, H, W = 2, 4, 16, 16
    P, E = 8, 32

    key = jax.random.PRNGKey(0)
    kx, kw, kb = jax.random.split(key, 3)
    x = jax.random.normal(kx, (B, C, H, W), dtype=jnp.float32)
    weight = jax.random.normal(kw, (E, C, P, P), dtype=jnp.float32) * 0.02
    bias = jax.random.normal(kb, (E,), dtype=jnp.float32) * 0.02

    # Plain-JAX f32 reference of the conv-as-matmul.
    Hp, Wp = H // P, W // P
    ref_patches = x.reshape(B, C, Hp, P, Wp, P).transpose(0, 2, 4, 1, 3, 5)
    ref_patches = ref_patches.reshape(B, Hp * Wp, C * P * P)
    ref = jnp.einsum("bnk,ek->bne", ref_patches, weight.reshape(E, -1)) + bias

    # 1) Default hot path: bf16 compute / f32 accumulate.
    fn = jax.jit(functools.partial(patch_embedding, patch_size=P))
    out = fn(x, weight, bias)
    jax.block_until_ready(out)
    assert out.shape == (B, Hp * Wp, E)
    assert out.dtype == x.dtype
    assert jnp.allclose(out, ref, atol=2e-2, rtol=2e-2), "bf16 path mismatch"

    # 2) f32 compute path, exercising the K-tiled accumulator (tk=128).
    fn32 = jax.jit(functools.partial(patch_embedding, patch_size=P,
                                     compute_dtype=jnp.float32, tk=128))
    out32 = fn32(x, weight, bias)
    jax.block_until_ready(out32)
    assert jnp.allclose(out32, ref, atol=1e-4, rtol=1e-4), "f32 path mismatch"

    print("KERNEL_OK")
</pallas_src>

<mosaic_0001>
module attributes {stable_mosaic.version = 11 : i64} {
  func.func @_patch_embed_kernel(%arg0: i32, %arg1: i32, %arg2: memref<16x256xbf16, #tpu.memory_space<vmem>>, %arg3: memref<256x128xbf16, #tpu.memory_space<vmem>>, %arg4: memref<1x128xf32, #tpu.memory_space<vmem>>, %arg5: memref<16x128xf32, #tpu.memory_space<vmem>>, %arg6: memref<16x128xf32, #tpu.memory_space<vmem>>) attributes {dimension_semantics = [#tpu.dimension_semantics<parallel>, #tpu.dimension_semantics<arbitrary>], iteration_bounds = array<i64: 1, 1>, scalar_prefetch = 0 : i64, scratch_operands = 1 : i64, tpu.core_type = #tpu.core_type<tc>, window_params = [{transform_indices = @transform_0, window_bounds = array<i64: 16, 256>}, {pipeline_mode = #tpu.pipeline_mode<synchronous>, transform_indices = @transform_1, window_bounds = array<i64: 256, 128>}, {pipeline_mode = #tpu.pipeline_mode<synchronous>, transform_indices = @transform_2, window_bounds = array<i64: 1, 128>}, {transform_indices = @transform_3, window_bounds = array<i64: 16, 128>}]} {
    %c0_i32 = arith.constant 0 : i32
    %0 = arith.cmpi eq, %arg1, %c0_i32 : i32
    %1 = arith.extui %0 : i1 to i32
    %c0_i32_0 = arith.constant 0 : i32
    %2 = arith.cmpi ne, %1, %c0_i32_0 : i32
    scf.if %2 {
      %cst_10 = arith.constant 0.000000e+00 : f32
      %12 = vector.broadcast %cst_10 : f32 to vector<16x128xf32>
      %c0_11 = arith.constant 0 : index
      %c0_12 = arith.constant 0 : index
      %13 = vector.load %arg6[%c0_11, %c0_12] : memref<16x128xf32, #tpu.memory_space<vmem>>, vector<16x128xf32>
      tpu.vector_store %arg6[%c0_11, %c0_12], %12 {strides = array<i32>} : memref<16x128xf32, #tpu.memory_space<vmem>>, vector<16x128xf32>,
    } else {
    }
    %c0 = arith.constant 0 : index
    %c0_1 = arith.constant 0 : index
    %3 = vector.load %arg6[%c0, %c0_1] : memref<16x128xf32, #tpu.memory_space<vmem>>, vector<16x128xf32>
    %c0_2 = arith.constant 0 : index
    %c0_3 = arith.constant 0 : index
    %4 = vector.load %arg2[%c0_2, %c0_3] : memref<16x256xbf16, #tpu.memory_space<vmem>>, vector<16x256xbf16>
    %c0_4 = arith.constant 0 : index
    %c0_5 = arith.constant 0 : index
    %5 = vector.load %arg3[%c0_4, %c0_5] : memref<256x128xbf16, #tpu.memory_space<vmem>>, vector<256x128xbf16>
    %cst = arith.constant dense<0.000000e+00> : vector<16x128xf32>
    %6 = tpu.matmul %4, %5, %cst {dimension_numbers = #tpu.dot_dimension_numbers<[1], [0], [0], [1], [0, 0, 1, 1], [], []>} : vector<16x256xbf16>, vector<256x128xbf16>, vector<16x128xf32> -> vector<16x128xf32>
    %7 = arith.addf %3, %6 : vector<16x128xf32>
    %c0_6 = arith.constant 0 : index
    %c0_7 = arith.constant 0 : index
    %8 = vector.load %arg6[%c0_6, %c0_7] : memref<16x128xf32, #tpu.memory_space<vmem>>, vector<16x128xf32>
    tpu.vector_store %arg6[%c0_6, %c0_7], %7 {strides = array<i32>} : memref<16x128xf32, #tpu.memory_space<vmem>>, vector<16x128xf32>,
    %c0_i32_8 = arith.constant 0 : i32
    %9 = arith.cmpi eq, %arg1, %c0_i32_8 : i32
    %10 = arith.extui %9 : i1 to i32
    %c0_i32_9 = arith.constant 0 : i32
    %11 = arith.cmpi ne, %10, %c0_i32_9 : i32
    scf.if %11 {
      %c0_10 = arith.constant 0 : index
      %c0_11 = arith.constant 0 : index
      %12 = vector.load %arg6[%c0_10, %c0_11] : memref<16x128xf32, #tpu.memory_space<vmem>>, vector<16x128xf32>
      %c0_12 = arith.constant 0 : index
      %c0_13 = arith.constant 0 : index
      %13 = vector.load %arg4[%c0_12, %c0_13] : memref<1x128xf32, #tpu.memory_space<vmem>>, vector<1x128xf32>
      %14 = vector.broadcast %13 : vector<1x128xf32> to vector<16x128xf32>
      %15 = arith.addf %12, %14 : vector<16x128xf32>
      %c0_14 = arith.constant 0 : index
      %c0_15 = arith.constant 0 : index
      %16 = vector.load %arg5[%c0_14, %c0_15] : memref<16x128xf32, #tpu.memory_space<vmem>>, vector<16x128xf32>
      tpu.vector_store %arg5[%c0_14, %c0_15], %15 {strides = array<i32>} : memref<16x128xf32, #tpu.memory_space<vmem>>, vector<16x128xf32>,
    } else {
    }
    return
  }
  func.func @transform_0(%arg0: i32, %arg1: i32) -> (i32, i32) {
    %c0_i32 = arith.constant 0 : i32
    return %arg0, %arg1 : i32, i32
  }
  func.func @transform_1(%arg0: i32, %arg1: i32) -> (i32, i32) {
    %c0_i32 = arith.constant 0 : i32
    %c0_i32_0 = arith.constant 0 : i32
    %c0_i32_1 = arith.constant 0 : i32
    return %c0_i32, %c0_i32_0 : i32, i32
  }
  func.func @transform_2(%arg0: i32, %arg1: i32) -> (i32, i32) {
    %c0_i32 = arith.constant 0 : i32
    %c0_i32_0 = arith.constant 0 : i32
    %c0_i32_1 = arith.constant 0 : i32
    return %c0_i32, %c0_i32_0 : i32, i32
  }
  func.func @transform_3(%arg0: i32, %arg1: i32) -> (i32, i32) {
    %c0_i32 = arith.constant 0 : i32
    %c0_i32_0 = arith.constant 0 : i32
    return %arg0, %c0_i32 : i32, i32
  }
}

</mosaic_0001>

<bundles_post_ra>
// kernel: patch_embedding.2
= control target key start
LH: loop header
LB: loop body
LE: loop exit
PB: predicated region body
PF: predicated region fallthrough
CT: control target
= control target key end

     0   :  { %s1349_s0 = inlined_call_operand.vmem [shape: bf16[256,32], index: 0, kind: input, shape index: {}]   ;;  %s1350_s1 = inlined_call_operand.<no memory space> [shape: bf16[], index: 1, kind: input, shape index: {}]   ;;  %s1351_s2 = inlined_call_operand.vmem [shape: bf16[8,256], index: 2, kind: input, shape index: {}]   ;;  %s1352_s3 = inlined_call_operand.vmem [shape: f32[1,32], index: 3, kind: input, shape index: {}]   ;;  %s1353_s4 = inlined_call_operand.<no memory space> [shape: f32[], index: 4, kind: input, shape index: {}]   ;;  %s1354_s5 = inlined_call_operand.vmem [shape: f32[16,128], index: 5, kind: output, shape index: {}]  }
   0x1   :  { %v10_v0 = vstv %s1350_s1  ;;  %v20_v1 = vstv %s1353_s4 }
   0x2   :  { %v1138_v2 = vunpack.i.l.bf16 %v10_v0 }
   0x3   :  { %v79_v3 = vlaneseq  ;;  %v1022_v4 = vld [vmem:[%s1349_s0 + $0x40] sm:$0xff]   ;;  %v1024_v6 = vld [vmem:[%s1349_s0 + $0x48] sm:$0xff]   ;;  %v1026_v13 = vld [vmem:[%s1349_s0 + $0x50] sm:$0xff]   ;;  %v1101_v32 = vmov 0.0  }
   0x4   :  { %v76_v5 = vld [vmem:[%s1349_s0] sm:$0xff]   ;;  %v1151_v7 = vpack.c.bf16 %v1138_v2, %v1138_v2  ;;  %v428_v8 = vunpack.c.l.bf16 %v1022_v4  ;;  %v450_v9 = vunpack.c.h.bf16 %v1022_v4  ;;  %v1008_v12 = vld [vmem:[%s1349_s0 + $0x8] sm:$0xff]   ;;  %v1010_v14 = vld [vmem:[%s1349_s0 + $0x10] sm:$0xff]   ;;  %v472_v16 = vunpack.c.l.bf16 %v1024_v6 }
   0x5   :  { %v77_v10 = vunpack.c.l.bf16 %v76_v5  ;;  %v98_v11 = vunpack.c.h.bf16 %v76_v5  ;;  %v1163_v15 = vand.u32 127, %v79_v3  ;;  %v494_v17 = vunpack.c.h.bf16 %v1024_v6  ;;  %v1028_v19 = vld [vmem:[%s1349_s0 + $0x58] sm:$0xff]   ;;  %v36_v31 = vld [vmem:[%s1351_s2] sm:$0xff]  }
   0x6   :  { %v120_v18 = vunpack.c.l.bf16 %v1008_v12  ;;  %v142_v20 = vunpack.c.h.bf16 %v1008_v12  ;;  %v516_v21 = vunpack.c.l.bf16 %v1026_v13  ;;  %v538_v22 = vunpack.c.h.bf16 %v1026_v13  ;;  %41 = vst [vmem:[#allocation18] sm:$0xff] %v36_v31   ;;  %v1012_v45 = vld [vmem:[%s1349_s0 + $0x18] sm:$0xff]   ;;  %v1030_v50 = vld [vmem:[%s1349_s0 + $0x60] sm:$0xff]   ;;  %v1016_v13 = vld [vmem:[%s1349_s0 + $0x28] sm:$0xff]  }
   0x7   :  { %v164_v23 = vunpack.c.l.bf16 %v1010_v14  ;;  %vm82_vm0 = vcmp.lt.s32.totalorder %v1163_v15, 32  ;;  %v186_v24 = vunpack.c.h.bf16 %v1010_v14  ;;  %v560_v25 = vunpack.c.l.bf16 %v1028_v19  ;;  %v1014_v55 = vld [vmem:[%s1349_s0 + $0x20] sm:$0xff]   ;;  %v1034_v14 = vld [vmem:[%s1349_s0 + $0x70] sm:$0xff]  }
   0x8   :  { %v582_v26 = vunpack.c.h.bf16 %v1028_v19  ;;  %v434_v27 = vsel %vm82_vm0, %v428_v8, %v1138_v2  ;;  %v456_v28 = vsel %vm82_vm0, %v450_v9, %v1138_v2  ;;  %v83_v29 = vsel %vm82_vm0, %v77_v10, %v1138_v2  ;;  %v1032_v8 = vld [vmem:[%s1349_s0 + $0x68] sm:$0xff]  }
   0x9   :  { %v104_v30 = vsel %vm82_vm0, %v98_v11, %v1138_v2  ;;  %v436_v33 = vpack.c.bf16 %v1101_v32, %v434_v27  ;;  %v458_v34 = vpack.c.bf16 %v1101_v32, %v456_v28  ;;  %v84_v35 = vpack.c.bf16 %v1101_v32, %v83_v29 }
   0xa   :  { %v106_v36 = vpack.c.bf16 %v1101_v32, %v104_v30  ;;  %v478_v37 = vsel %vm82_vm0, %v472_v16, %v1138_v2  ;;  %v500_v38 = vsel %vm82_vm0, %v494_v17, %v1138_v2  ;;  %v126_v39 = vsel %vm82_vm0, %v120_v18, %v1138_v2  ;;  %v1018_v16 = vld [vmem:[%s1349_s0 + $0x30] sm:$0xff]  }
   0xb   :  { %v148_v40 = vsel %vm82_vm0, %v142_v20, %v1138_v2  ;;  %438 = vst [vmem:[#allocation19 + $0x40] sm:$0xf] %v436_v33  ;;  %460 = vst [vmem:[#allocation19 + $0x44] sm:$0xf] %v458_v34  ;;  %v480_v41 = vpack.c.bf16 %v1101_v32, %v478_v37  ;;  %v502_v42 = vpack.c.bf16 %v1101_v32, %v500_v38  ;;  %v208_v58 = vunpack.c.l.bf16 %v1012_v45  ;;  %v1036_v33 = vld [vmem:[%s1349_s0 + $0x78] sm:$0xff]  }
   0xc   :  { %86 = vst [vmem:[#allocation19] sm:$0xf] %v84_v35  ;;  %108 = vst [vmem:[#allocation19 + $0x4] sm:$0xf] %v106_v36  ;;  %v128_v43 = vpack.c.bf16 %v1101_v32, %v126_v39  ;;  %v150_v44 = vpack.c.bf16 %v1101_v32, %v148_v40  ;;  %v522_v46 = vsel %vm82_vm0, %v516_v21, %v1138_v2  ;;  %v230_v59 = vunpack.c.h.bf16 %v1012_v45  ;;  %v1020_v39 = vld [vmem:[%s1349_s0 + $0x38] sm:$0xff]  }
   0xd   :  { %v544_v47 = vsel %vm82_vm0, %v538_v22, %v1138_v2  ;;  %v170_v48 = vsel %vm82_vm0, %v164_v23, %v1138_v2  ;;  %v192_v49 = vsel %vm82_vm0, %v186_v24, %v1138_v2  ;;  %482 = vst [vmem:[#allocation19 + $0x48] sm:$0xf] %v480_v41  ;;  %504 = vst [vmem:[#allocation19 + $0x4c] sm:$0xf] %v502_v42  ;;  %v604_v62 = vunpack.c.l.bf16 %v1030_v50 }
   0xe   :  { %130 = vst [vmem:[#allocation19 + $0x8] sm:$0xf] %v128_v43  ;;  %152 = vst [vmem:[#allocation19 + $0xc] sm:$0xf] %v150_v44  ;;  %v524_v51 = vpack.c.bf16 %v1101_v32, %v522_v46  ;;  %v546_v52 = vpack.c.bf16 %v1101_v32, %v544_v47  ;;  %v172_v53 = vpack.c.bf16 %v1101_v32, %v170_v48  ;;  %v626_v63 = vunpack.c.h.bf16 %v1030_v50 }
   0xf   :  { %v194_v54 = vpack.c.bf16 %v1101_v32, %v192_v49  ;;  %v566_v56 = vsel %vm82_vm0, %v560_v25, %v1138_v2  ;;  %v588_v57 = vsel %vm82_vm0, %v582_v26, %v1138_v2  ;;  %v214_v0 = vsel %vm82_vm0, %v208_v58, %v1138_v2  ;;  %v791_v49 = vld [vmem:[#allocation18] sm:$0xff] }
  0x10   :  { %526 = vst [vmem:[#allocation19 + $0x50] sm:$0xf] %v524_v51  ;;  %548 = vst [vmem:[#allocation19 + $0x54] sm:$0xf] %v546_v52  ;;  %v568_v60 = vpack.c.bf16 %v1101_v32, %v566_v56  ;;  %v590_v61 = vpack.c.bf16 %v1101_v32, %v588_v57  ;;  %v236_v4 = vsel %vm82_vm0, %v230_v59, %v1138_v2  ;;  %v252_v5 = vunpack.c.l.bf16 %v1014_v55 }
  0x11   :  { %174 = vst [vmem:[#allocation19 + $0x10] sm:$0xf] %v172_v53  ;;  %196 = vst [vmem:[#allocation19 + $0x14] sm:$0xf] %v194_v54  ;;  %v274_v6 = vunpack.c.h.bf16 %v1014_v55  ;;  %v216_v9 = vpack.c.bf16 %v1101_v32, %v214_v0  ;;  %v238_v10 = vpack.c.bf16 %v1101_v32, %v236_v4  ;;  %v610_v11 = vsel %vm82_vm0, %v604_v62, %v1138_v2 }
  0x12   :  { %570 = vst [vmem:[#allocation19 + $0x58] sm:$0xf] %v568_v60  ;;  %592 = vst [vmem:[#allocation19 + $0x5c] sm:$0xf] %v590_v61  ;;  %v632_v12 = vsel %vm82_vm0, %v626_v63, %v1138_v2  ;;  %v1085_v17 = vld [vmem:[#allocation19 + $0x40] sm:$0xff]   ;;  %v612_v18 = vpack.c.bf16 %v1101_v32, %v610_v11  ;;  %v258_v20 = vsel %vm82_vm0, %v252_v5, %v1138_v2  ;;  %v648_v25 = vunpack.c.l.bf16 %v1032_v8 }
  0x13   :  { %v634_v19 = vpack.c.bf16 %v1101_v32, %v632_v12  ;;  %v280_v21 = vsel %vm82_vm0, %v274_v6, %v1138_v2  ;;  %v1086_v22 = vld [vmem:[#allocation19] sm:$0xff]   ;;  %218 = vst [vmem:[#allocation19 + $0x18] sm:$0xf] %v216_v9  ;;  %240 = vst [vmem:[#allocation19 + $0x1c] sm:$0xf] %v238_v10  ;;  %v260_v23 = vpack.c.bf16 %v1101_v32, %v258_v20  ;;  %v670_v26 = vunpack.c.h.bf16 %v1032_v8 }
  0x14   :  { %v282_v24 = vpack.c.bf16 %v1101_v32, %v280_v21  ;;  %1062 = vmatprep.subr.bf16.mxu0 %v1085_v17  ;;  %v1087_v27 = vld [vmem:[#allocation19 + $0x48] sm:$0xff]   ;;  %614 = vst [vmem:[#allocation19 + $0x60] sm:$0xf] %v612_v18  ;;  %v296_v28 = vunpack.c.l.bf16 %v1016_v13  ;;  %v318_v29 = vunpack.c.h.bf16 %v1016_v13  ;;  %v692_v30 = vunpack.c.l.bf16 %v1034_v14 }
  0x15   :  { %636 = vst [vmem:[#allocation19 + $0x64] sm:$0xf] %v634_v19  ;;  %v714_v31 = vunpack.c.h.bf16 %v1034_v14  ;;  %1063 = vmatpush3.bf16.msra.mxu0 %v1086_v22  ;;  %v1088_v34 = vld [vmem:[#allocation19 + $0x8] sm:$0xff]   ;;  %262 = vst [vmem:[#allocation19 + $0x20] sm:$0xf] %v260_v23  ;;  %v654_v35 = vsel %vm82_vm0, %v648_v25, %v1138_v2  ;;  %v676_v36 = vsel %vm82_vm0, %v670_v26, %v1138_v2  ;;  %v340_v37 = vunpack.c.l.bf16 %v1018_v16 }
  0x16   :  { %284 = vst [vmem:[#allocation19 + $0x24] sm:$0xf] %v282_v24  ;;  %v362_v38 = vunpack.c.h.bf16 %v1018_v16  ;;  %1064 = vmatprep.subr.bf16.mxu0 %v1087_v27  ;;  %v656_v41 = vpack.c.bf16 %v1101_v32, %v654_v35  ;;  %v678_v42 = vpack.c.bf16 %v1101_v32, %v676_v36  ;;  %v302_v43 = vsel %vm82_vm0, %v296_v28, %v1138_v2 }
  0x17   :  { %v1089_v40 = vld [vmem:[#allocation19 + $0x50] sm:$0xff]   ;;  %v324_v44 = vsel %vm82_vm0, %v318_v29, %v1138_v2  ;;  %v304_v45 = vpack.c.bf16 %v1101_v32, %v302_v43  ;;  %v698_v47 = vsel %vm82_vm0, %v692_v30, %v1138_v2  ;;  %v720_v48 = vsel %vm82_vm0, %v714_v31, %v1138_v2 }
  0x18   :  { %v326_v46 = vpack.c.bf16 %v1101_v32, %v324_v44  ;;  %658 = vst [vmem:[#allocation19 + $0x68] sm:$0xf] %v656_v41  ;;  %680 = vst [vmem:[#allocation19 + $0x6c] sm:$0xf] %v678_v42  ;;  %v700_v50 = vpack.c.bf16 %v1101_v32, %v698_v47  ;;  %v722_v51 = vpack.c.bf16 %v1101_v32, %v720_v48  ;;  %v1090_v54 = vld [vmem:[#allocation19 + $0x10] sm:$0xff]   ;;  %v736_v57 = vunpack.c.l.bf16 %v1036_v33 }
  0x19   :  { %v346_v52 = vsel %vm82_vm0, %v340_v37, %v1138_v2  ;;  %v368_v53 = vsel %vm82_vm0, %v362_v38, %v1138_v2  ;;  %1065 = vmatpush3.bf16.msra.mxu0 %v1088_v34  ;;  %306 = vst [vmem:[#allocation19 + $0x28] sm:$0xf] %v304_v45  ;;  %v758_v58 = vunpack.c.h.bf16 %v1036_v33  ;;  %v1091_v59 = vld [vmem:[#allocation19 + $0x58] sm:$0xff]   ;;  %v384_v60 = vunpack.c.l.bf16 %v1020_v39 }
  0x1a   :  { %328 = vst [vmem:[#allocation19 + $0x2c] sm:$0xf] %v326_v46  ;;  %v348_v55 = vpack.c.bf16 %v1101_v32, %v346_v52  ;;  %v370_v56 = vpack.c.bf16 %v1101_v32, %v368_v53  ;;  %1066 = vmatprep.subr.bf16.mxu0 %v1089_v40  ;;  %702 = vst [vmem:[#allocation19 + $0x70] sm:$0xf] %v700_v50  ;;  %v406_v61 = vunpack.c.h.bf16 %v1020_v39  ;;  %v1092_v9 = vld [vmem:[#allocation19 + $0x18] sm:$0xff]  }
  0x1b   :  { %724 = vst [vmem:[#allocation19 + $0x74] sm:$0xf] %v722_v51  ;;  %v1039_v62 = vcombine.high %v791_v49, %v1151_v7  ;;  %v742_v63 = vsel %vm82_vm0, %v736_v57, %v1138_v2  ;;  %v764_v0 = vsel %vm82_vm0, %v758_v58, %v1138_v2  ;;  %v390_v6 = vsel %vm82_vm0, %v384_v60, %v1138_v2 }
  0x1c   :  { %350 = vst [vmem:[#allocation19 + $0x30] sm:$0xf] %v348_v55  ;;  %372 = vst [vmem:[#allocation19 + $0x34] sm:$0xf] %v370_v56  ;;  %v744_v4 = vpack.c.bf16 %v1101_v32, %v742_v63  ;;  %v766_v5 = vpack.c.bf16 %v1101_v32, %v764_v0  ;;  %v412_v8 = vsel %vm82_vm0, %v406_v61, %v1138_v2  ;;  %v1093_v12 = vld [vmem:[#allocation19 + $0x60] sm:$0xff]  }
  0x1d   :  { %963 = vmatprep.mubr.bf16.mxu0 %v1039_v62  ;;  %1067 = vmatpush3.bf16.msra.mxu0 %v1090_v54  ;;  %v392_v10 = vpack.c.bf16 %v1101_v32, %v390_v6  ;;  %v414_v11 = vpack.c.bf16 %v1101_v32, %v412_v8  ;;  %v1094_v13 = vld [vmem:[#allocation19 + $0x20] sm:$0xff]   ;;  %v1038_v19 = vcombine.low %v791_v49, %v1151_v7 }
  0x1e   :  { %1068 = vmatprep.subr.bf16.mxu0 %v1091_v59  ;;  %746 = vst [vmem:[#allocation19 + $0x78] sm:$0xf] %v744_v4  ;;  %768 = vst [vmem:[#allocation19 + $0x7c] sm:$0xf] %v766_v5 }
  0x1f   :  { %394 = vst [vmem:[#allocation19 + $0x38] sm:$0xf] %v392_v10  ;;  %416 = vst [vmem:[#allocation19 + $0x3c] sm:$0xf] %v414_v11  ;;  %v1095_v14 = vld [vmem:[#allocation19 + $0x68] sm:$0xff]  }
  0x21   :  { %1069 = vmatpush3.bf16.msra.mxu0 %v1092_v9  ;;  %v1096_v16 = vld [vmem:[#allocation19 + $0x28] sm:$0xff]  }
  0x22   :  { %1070 = vmatprep.subr.bf16.mxu0 %v1093_v12  ;;  %v1097_v2 = vld [vmem:[#allocation19 + $0x70] sm:$0xff]  }
  0x23   :  { %v1098_v17 = vld [vmem:[#allocation19 + $0x30] sm:$0xff]  }
  0x25   :  { %1071 = vmatpush3.bf16.msra.mxu0 %v1094_v13  ;;  %v1099_v18 = vld [vmem:[#allocation19 + $0x78] sm:$0xff]  }
  0x26   :  { %1072 = vmatprep.subr.bf16.mxu0 %v1095_v14  ;;  %v1100_v32 = vld [vmem:[#allocation19 + $0x38] sm:$0xff]  }
  0x29   :  { %1073 = vmatpush3.bf16.msra.mxu0 %v1096_v16 }
  0x2a   :  { %1074 = vmatprep.subr.bf16.mxu0 %v1097_v2 }
  0x2d   :  { %1075 = vmatpush3.bf16.msra.mxu0 %v1098_v17 }
  0x2e   :  { %1076 = vmatprep.subr.bf16.mxu0 %v1099_v18 }
  0x31   :  { %1077 = vmatpush3.bf16.msra.mxu0 %v1100_v32 }
  0x34   :  { %964 = vmatmul.mubr.bf16.vlgmr.msra.gmra.mrb[0].mxu0 %v1038_v19 }
 0x107   :  { %v1078_v20 = vpop.f32.mrb[0].mxu0 }
 0x108   :  { %v1079_v21 = vpop.f32.mrb[1].mxu0 }
 0x109   :  { %v1080_v22 = vadd.f32 %v1079_v21, %v1078_v20  ;;  %v1081_v23 = vpop.f32.mrb[2].mxu0 }
 0x10a   :  { %v1082_v24 = vpop.f32.mrb[3].mxu0 }
 0x10b   :  { %v1083_v25 = vadd.f32 %v1082_v24, %v1081_v23 }
 0x10c   :  { %v996_v26 = vld [vmem:[%s1352_s3] sm:$0x1]  ;;  %v998_v27 = vshrl.u32 %v79_v3, 7 }
 0x10e   :  { %vm999_vm1 = vcmp.lt.s32.totalorder %v998_v27, 1 }
 0x10f   :  { %v1000_v7 = vsel %vm999_vm1, %v996_v26, %v20_v1 }
 0x110   :  { %v1004_v28 = vsel %vm82_vm0, %v1000_v7, %v20_v1 }
 0x111   :  { %1005 = vst [vmem:[#allocation21] sm:$0x1] %v1004_v28 }
 0x118   :  { %v1056_v29 = vld [vmem:[#allocation21] ss:$0 sm:$0xff] }
 0x119   :  { %v988_v30 = vadd.f32 %v1080_v22, %v1056_v29  ;;  %v989_v31 = vadd.f32 %v1083_v25, %v1056_v29 }
 0x11b   :  { %990 = vst [vmem:[%s1354_s5] sm:$0xff] %v988_v30  ;;  %991 = vst [vmem:[%s1354_s5 + $0x8] sm:$0xff] %v989_v31 }

</bundles_post_ra>
